<compile_context>
chip_gen: v6e
topology: v6e:2x2x1
jax: 0.10.0
libtpu: 0.0.40
codegen_flags: <defaults>
</compile_context>

<pallas_src>
import jax
import jax.numpy as jnp
import numpy as np
from jax.experimental import pallas as pl
from jax.experimental.pallas import tpu as pltpu

TEMP = 0.05          # `temp` global in the torch module
SHARE_MODEL = True   # question / reference encoders share weights


# ----------------------------------------------------------------------------
# Single fused kernel:
#   encode(pos) + encode(neg) + encode(q) + scores + cross-entropy + accuracy
# ----------------------------------------------------------------------------
def fused_qrd_kernel(ids_p_ref, ids_n_ref, ids_q_ref,
                     mask_p_ref, mask_n_ref, mask_q_ref,
                     emb_ref, w_ref, out_ref):
    # ---- parameter-only work first: collapse emb @ w into one operand -------
    # (exact by linearity; independent of ids/mask so it overlaps the hist
    #  build on the VPU/XLU)
    ew = jnp.dot(emb_ref[...], w_ref[...],
                 preferred_element_type=jnp.float32)                 # (V, H)

    # ---- assemble [pos; neg; q] rows inside the kernel ----------------------
    ids = jnp.concatenate(
        [ids_p_ref[...], ids_n_ref[...], ids_q_ref[...]], axis=0)    # (3B, S)
    mask = jnp.concatenate(
        [mask_p_ref[...], mask_n_ref[...], mask_q_ref[...]], axis=0)  # (3B, S)

    BB, S = ids.shape
    V = ew.shape[0]
    B = BB // 3
    N = 2 * B                        # len(kemb) = 2B (pos + neg)

    # ---- fold 1/counts (mean pooling) and 1/temp (q rows) into the mask -----
    counts = jnp.sum(mask, axis=1, keepdims=True)                    # (3B, 1)
    row_id = jax.lax.broadcasted_iota(jnp.int32, (BB, 1), 0)
    scale = jnp.where(row_id >= N, 1.0 / TEMP, 1.0) / counts         # (3B, 1)
    mask_norm = mask * scale                                         # (3B, S)

    # ---- embedding gather + masked mean pooling as one contraction ----------
    # hist[r, v] = sum_s mask_norm[r, s] * [ids[r, s] == v]
    #   => cls_all = hist @ (emb @ w)
    #   ==  masked-mean(emb[ids]) @ w   (with the q rows already / temp)
    v_iota = jax.lax.broadcasted_iota(jnp.int32, (BB, S, V), 2)
    weighted = jnp.where(ids[:, :, None] == v_iota,
                         mask_norm[:, :, None], 0.0)                 # (3B,S,V)
    hist = jnp.sum(weighted, axis=1)                                 # (3B, V)

    cls_all = jnp.dot(hist, ew,
                      preferred_element_type=jnp.float32)            # (3B, H)

    kemb = cls_all[0:N, :]            # torch.cat([pos, neg])          (2B, H)
    cls_q = cls_all[N:BB, :]          # already divided by temp        (B,  H)

    # ---- scores = cls_q @ kemb.T, cross-entropy + accuracy ------------------
    scores = jnp.einsum('bh,nh->bn', cls_q, kemb,
                        preferred_element_type=jnp.float32)          # (B, 2B)

    m = jnp.max(scores, axis=-1, keepdims=True)                      # (B, 1)
    z = scores - m
    lse = jnp.log(jnp.sum(jnp.exp(z), axis=-1, keepdims=True))       # exact div/log
    logsm = z - lse                                                  # (B, 2B)

    # labels = arange(B)  (rank 0, world_size 1)
    row = jax.lax.broadcasted_iota(jnp.int32, (B, N), 0)
    col = jax.lax.broadcasted_iota(jnp.int32, (B, N), 1)

    picked = jnp.sum(jnp.where(col == row, logsm, 0.0),
                     axis=-1, keepdims=True)                         # (B, 1)
    loss = -jnp.mean(picked, keepdims=True)                          # (1, 1)

    # accuracy: first argmax == label; reuse m (no second cross-lane max)
    is_max = scores >= m
    preds = jnp.min(jnp.where(is_max, col, N), axis=-1, keepdims=True)
    correct = (preds == row[:, 0:1]).astype(jnp.float32)
    acc = jnp.mean(correct, keepdims=True)                           # (1, 1)

    out_ref[...] = jnp.concatenate([loss, acc], axis=1)              # (1, 2)


# ----------------------------------------------------------------------------
# Full forward (mirrors QuestionReferenceDensity_fromContriever.forward)
# ----------------------------------------------------------------------------
def qr_density_forward(ids_q, mask_q, ids_p, mask_p, ids_n, mask_n,
                       emb_table, w, return_acc=True):
    # share_model=True -> same encoder weights for question and references.
    vmem = pl.BlockSpec(memory_space=pltpu.MemorySpace.VMEM)
    out = pl.pallas_call(
        fused_qrd_kernel,
        out_shape=jax.ShapeDtypeStruct((1, 2), jnp.float32),
        in_specs=[vmem] * 8,
        out_specs=pl.BlockSpec(memory_space=pltpu.MemorySpace.VMEM),
    )(ids_p, ids_n, ids_q, mask_p, mask_n, mask_q, emb_table, w)

    if return_acc:
        return out[0, 0], out[0, 1]
    return out[0, 0]


# ----------------------------------------------------------------------------
# Pure-JAX reference (for correctness check)
# ----------------------------------------------------------------------------
def reference_forward(ids_q, mask_q, ids_p, mask_p, ids_n, mask_n, emb_table, w):
    def enc(ids, mask):
        tok = emb_table[ids]
        proj = tok @ w
        masked = proj * mask[..., None]
        return masked.sum(axis=1) / mask.sum(axis=1, keepdims=True)

    cls_q = enc(ids_q, mask_q) / TEMP
    kemb = jnp.concatenate([enc(ids_p, mask_p), enc(ids_n, mask_n)], axis=0)
    scores = cls_q @ kemb.T
    B = cls_q.shape[0]
    labels = jnp.arange(B)
    logsm = jax.nn.log_softmax(scores, axis=-1)
    loss = -jnp.mean(logsm[jnp.arange(B), labels])
    acc = jnp.mean((jnp.argmax(scores, axis=-1) == labels).astype(jnp.float32))
    return loss, acc


if __name__ == "__main__":
    B, S, H, V = 4, 16, 128, 32   # batch, seq, hidden, vocab

    key = jax.random.PRNGKey(0)
    kq, kp, kn, ke, kw = jax.random.split(key, 5)

    ids_q = jax.random.randint(kq, (B, S), 0, V, dtype=jnp.int32)
    ids_p = jax.random.randint(kp, (B, S), 0, V, dtype=jnp.int32)
    ids_n = jax.random.randint(kn, (B, S), 0, V, dtype=jnp.int32)

    # variable-length attention masks (no all-zero rows; an all-zero row would
    # be NaN in both kernel and reference, matching the torch module)
    lens_q = jnp.array([16, 12, 9, 5])
    lens_p = jnp.array([14, 16, 7, 11])
    lens_n = jnp.array([10, 6, 16, 13])
    pos = jnp.arange(S)[None, :]
    mask_q = (pos < lens_q[:, None]).astype(jnp.float32)
    mask_p = (pos < lens_p[:, None]).astype(jnp.float32)
    mask_n = (pos < lens_n[:, None]).astype(jnp.float32)

    # deterministic synthetic encoder parameters
    emb_table = 0.02 * jax.random.normal(ke, (V, H), dtype=jnp.float32)
    w = 0.02 * jax.random.normal(kw, (H, H), dtype=jnp.float32)

    loss, acc = qr_density_forward(ids_q, mask_q, ids_p, mask_p, ids_n, mask_n,
                                   emb_table, w, return_acc=True)
    jax.block_until_ready((loss, acc))

    loss_ref, acc_ref = reference_forward(ids_q, mask_q, ids_p, mask_p,
                                          ids_n, mask_n, emb_table, w)
    np.testing.assert_allclose(np.asarray(loss), np.asarray(loss_ref),
                               rtol=1e-4, atol=1e-5)
    np.testing.assert_allclose(np.asarray(acc), np.asarray(acc_ref),
                               rtol=1e-4, atol=1e-5)

    print("KERNEL_OK")
</pallas_src>

<mosaic_0001>
module attributes {stable_mosaic.version = 11 : i64} {
  func.func @fused_qrd_kernel(%arg0: memref<4x16xi32, #tpu.memory_space<vmem>>, %arg1: memref<4x16xi32, #tpu.memory_space<vmem>>, %arg2: memref<4x16xi32, #tpu.memory_space<vmem>>, %arg3: memref<4x16xf32, #tpu.memory_space<vmem>>, %arg4: memref<4x16xf32, #tpu.memory_space<vmem>>, %arg5: memref<4x16xf32, #tpu.memory_space<vmem>>, %arg6: memref<32x128xf32, #tpu.memory_space<vmem>>, %arg7: memref<128x128xf32, #tpu.memory_space<vmem>>, %arg8: memref<1x2xf32, #tpu.memory_space<vmem>>) attributes {dimension_semantics = [], scalar_prefetch = 0 : i64, scratch_operands = 0 : i64, tpu.core_type = #tpu.core_type<tc>} {
    %c0 = arith.constant 0 : index
    %c0_0 = arith.constant 0 : index
    %0 = vector.load %arg6[%c0, %c0_0] : memref<32x128xf32, #tpu.memory_space<vmem>>, vector<32x128xf32>
    %c0_1 = arith.constant 0 : index
    %c0_2 = arith.constant 0 : index
    %1 = vector.load %arg7[%c0_1, %c0_2] : memref<128x128xf32, #tpu.memory_space<vmem>>, vector<128x128xf32>
    %cst = arith.constant dense<0.000000e+00> : vector<32x128xf32>
    %2 = tpu.matmul %0, %1, %cst {dimension_numbers = #tpu.dot_dimension_numbers<[1], [0], [0], [1], [0, 0, 1, 1], [], []>} : vector<32x128xf32>, vector<128x128xf32>, vector<32x128xf32> -> vector<32x128xf32>
    %c0_3 = arith.constant 0 : index
    %c0_4 = arith.constant 0 : index
    %3 = vector.load %arg0[%c0_3, %c0_4] : memref<4x16xi32, #tpu.memory_space<vmem>>, vector<4x16xi32>
    %c0_5 = arith.constant 0 : index
    %c0_6 = arith.constant 0 : index
    %4 = vector.load %arg1[%c0_5, %c0_6] : memref<4x16xi32, #tpu.memory_space<vmem>>, vector<4x16xi32>
    %c0_7 = arith.constant 0 : index
    %c0_8 = arith.constant 0 : index
    %5 = vector.load %arg2[%c0_7, %c0_8] : memref<4x16xi32, #tpu.memory_space<vmem>>, vector<4x16xi32>
    %6 = tpu.concatenate %3, %4, %5 in 0 : vector<4x16xi32>, vector<4x16xi32>, vector<4x16xi32> -> vector<12x16xi32>
    %c0_9 = arith.constant 0 : index
    %c0_10 = arith.constant 0 : index
    %7 = vector.load %arg3[%c0_9, %c0_10] : memref<4x16xf32, #tpu.memory_space<vmem>>, vector<4x16xf32>
    %c0_11 = arith.constant 0 : index
    %c0_12 = arith.constant 0 : index
    %8 = vector.load %arg4[%c0_11, %c0_12] : memref<4x16xf32, #tpu.memory_space<vmem>>, vector<4x16xf32>
    %c0_13 = arith.constant 0 : index
    %c0_14 = arith.constant 0 : index
    %9 = vector.load %arg5[%c0_13, %c0_14] : memref<4x16xf32, #tpu.memory_space<vmem>>, vector<4x16xf32>
    %10 = tpu.concatenate %7, %8, %9 in 0 : vector<4x16xf32>, vector<4x16xf32>, vector<4x16xf32> -> vector<12x16xf32>
    %cst_15 = arith.constant dense<0.000000e+00> : vector<12xf32>
    %11 = vector.multi_reduction <add>, %10, %cst_15 [1] : vector<12x16xf32> to vector<12xf32>
    %12 = vector.shape_cast %11 : vector<12xf32> to vector<12x1xf32>
    %13 = tpu.iota {dimensions = array<i32: 0>} : vector<12x1xi32>
    %c8_i32 = arith.constant 8 : i32
    %14 = vector.broadcast %c8_i32 : i32 to vector<12x1xi32>
    %15 = arith.cmpi sge, %13, %14 : vector<12x1xi32>
    %cst_16 = arith.constant 2.000000e+01 : f32
    %cst_17 = arith.constant 1.000000e+00 : f32
    %16 = vector.broadcast %cst_16 : f32 to vector<12x1xf32>
    %17 = vector.broadcast %cst_17 : f32 to vector<12x1xf32>
    %18 = arith.select %15, %16, %17 : vector<12x1xi1>, vector<12x1xf32>
    %19 = arith.divf %18, %12 : vector<12x1xf32>
    %20 = vector.broadcast %19 : vector<12x1xf32> to vector<12x16xf32>
    %21 = arith.mulf %10, %20 : vector<12x16xf32>
    %22 = tpu.iota {dimensions = array<i32: 2>} : vector<12x16x32xi32>
    %23 = vector.shape_cast %6 : vector<12x16xi32> to vector<12x16x1xi32>
    %24 = vector.broadcast %23 : vector<12x16x1xi32> to vector<12x16x32xi32>
    %25 = arith.cmpi eq, %24, %22 : vector<12x16x32xi32>
    %26 = vector.shape_cast %21 : vector<12x16xf32> to vector<12x16x1xf32>
    %cst_18 = arith.constant 0.000000e+00 : f32
    %27 = vector.shape_cast %26 : vector<12x16x1xf32> to vector<12x16x1xf32>
    %28 = vector.broadcast %27 : vector<12x16x1xf32> to vector<12x16x32xf32>
    %29 = vector.broadcast %cst_18 : f32 to vector<12x16x32xf32>
    %30 = arith.select %25, %28, %29 : vector<12x16x32xi1>, vector<12x16x32xf32>
    %cst_19 = arith.constant dense<0.000000e+00> : vector<12x32xf32>
    %31 = vector.multi_reduction <add>, %30, %cst_19 [1] : vector<12x16x32xf32> to vector<12x32xf32>
    %cst_20 = arith.constant dense<0.000000e+00> : vector<12x128xf32>
    %32 = tpu.matmul %31, %2, %cst_20 {dimension_numbers = #tpu.dot_dimension_numbers<[1], [0], [0], [1], [0, 0, 1, 1], [], []>} : vector<12x32xf32>, vector<32x128xf32>, vector<12x128xf32> -> vector<12x128xf32>
    %33 = vector.extract_strided_slice %32 {offsets = [0, 0], sizes = [8, 128], strides = [1, 1]} : vector<12x128xf32> to vector<8x128xf32>
    %34 = vector.extract_strided_slice %32 {offsets = [8, 0], sizes = [4, 128], strides = [1, 1]} : vector<12x128xf32> to vector<4x128xf32>
    "tpu.trace_start"() <{level = 10 : i32, message = "bh,nh->bn"}> : () -> ()
    %cst_21 = arith.constant dense<0.000000e+00> : vector<4x8xf32>
    %35 = tpu.matmul %34, %33, %cst_21 {dimension_numbers = #tpu.dot_dimension_numbers<[1], [1], [0], [0], [0, 0, 1, 0], [], []>} : vector<4x128xf32>, vector<8x128xf32>, vector<4x8xf32> -> vector<4x8xf32>
    "tpu.trace_stop"() : () -> ()
    %cst_22 = arith.constant dense<0xFF800000> : vector<4xf32>
    %36 = vector.multi_reduction <maximumf>, %35, %cst_22 [1] : vector<4x8xf32> to vector<4xf32>
    %37 = vector.shape_cast %36 : vector<4xf32> to vector<4x1xf32>
    %38 = vector.broadcast %37 : vector<4x1xf32> to vector<4x8xf32>
    %39 = arith.subf %35, %38 : vector<4x8xf32>
    %40 = math.exp %39 : vector<4x8xf32>
    %cst_23 = arith.constant dense<0.000000e+00> : vector<4xf32>
    %41 = vector.multi_reduction <add>, %40, %cst_23 [1] : vector<4x8xf32> to vector<4xf32>
    %42 = vector.shape_cast %41 : vector<4xf32> to vector<4x1xf32>
    %43 = math.log %42 : vector<4x1xf32>
    %44 = vector.broadcast %43 : vector<4x1xf32> to vector<4x8xf32>
    %45 = arith.subf %39, %44 : vector<4x8xf32>
    %46 = tpu.iota {dimensions = array<i32: 0>} : vector<4x8xi32>
    %47 = tpu.iota {dimensions = array<i32: 1>} : vector<4x8xi32>
    %48 = arith.cmpi eq, %47, %46 : vector<4x8xi32>
    %cst_24 = arith.constant 0.000000e+00 : f32
    %49 = vector.broadcast %cst_24 : f32 to vector<4x8xf32>
    %50 = arith.select %48, %45, %49 : vector<4x8xi1>, vector<4x8xf32>
    %cst_25 = arith.constant dense<0.000000e+00> : vector<4xf32>
    %51 = vector.multi_reduction <add>, %50, %cst_25 [1] : vector<4x8xf32> to vector<4xf32>
    %52 = vector.shape_cast %51 : vector<4xf32> to vector<4x1xf32>
    %53 = vector.shape_cast %52 : vector<4x1xf32> to vector<1x4x1xf32>
    %cst_26 = arith.constant dense<0.000000e+00> : vector<1xf32>
    %54 = vector.multi_reduction <add>, %53, %cst_26 [1, 2] : vector<1x4x1xf32> to vector<1xf32>
    %55 = vector.shape_cast %54 : vector<1xf32> to vector<1x1x1xf32>
    %56 = vector.extract %55[0, 0, 0] : f32 from vector<1x1x1xf32>
    %57 = vector.broadcast %56 : f32 to vector<1x1xf32>
    %cst_27 = arith.constant 4.000000e+00 : f32
    %58 = vector.broadcast %cst_27 : f32 to vector<1x1xf32>
    %59 = arith.divf %57, %58 : vector<1x1xf32>
    %cst_28 = arith.constant 0.000000e+00 : f32
    %60 = vector.broadcast %cst_28 : f32 to vector<1x1xf32>
    %61 = arith.subf %60, %59 : vector<1x1xf32>
    %62 = vector.broadcast %37 : vector<4x1xf32> to vector<4x8xf32>
    %63 = arith.cmpf oge, %35, %62 : vector<4x8xf32>
    %c8_i32_29 = arith.constant 8 : i32
    %64 = vector.broadcast %c8_i32_29 : i32 to vector<4x8xi32>
    %65 = arith.select %63, %47, %64 : vector<4x8xi1>, vector<4x8xi32>
    %cst_30 = arith.constant dense<2147483647> : vector<4xi32>
    %66 = vector.multi_reduction <minsi>, %65, %cst_30 [1] : vector<4x8xi32> to vector<4xi32>
    %67 = vector.shape_cast %66 : vector<4xi32> to vector<4x1xi32>
    %68 = vector.extract_strided_slice %46 {offsets = [0, 0], sizes = [4, 1], strides = [1, 1]} : vector<4x8xi32> to vector<4x1xi32>
    %69 = arith.cmpi eq, %67, %68 : vector<4x1xi32>
    %70 = arith.extui %69 : vector<4x1xi1> to vector<4x1xi32>
    %71 = arith.sitofp %70 : vector<4x1xi32> to vector<4x1xf32>
    %72 = vector.shape_cast %71 : vector<4x1xf32> to vector<1x4x1xf32>
    %cst_31 = arith.constant dense<0.000000e+00> : vector<1xf32>
    %73 = vector.multi_reduction <add>, %72, %cst_31 [1, 2] : vector<1x4x1xf32> to vector<1xf32>
    %74 = vector.shape_cast %73 : vector<1xf32> to vector<1x1x1xf32>
    %75 = vector.extract %74[0, 0, 0] : f32 from vector<1x1x1xf32>
    %76 = vector.broadcast %75 : f32 to vector<1x1xf32>
    %cst_32 = arith.constant 4.000000e+00 : f32
    %77 = vector.broadcast %cst_32 : f32 to vector<1x1xf32>
    %78 = arith.divf %76, %77 : vector<1x1xf32>
    %79 = tpu.concatenate %61, %78 in 1 : vector<1x1xf32>, vector<1x1xf32> -> vector<1x2xf32>
    %c0_33 = arith.constant 0 : index
    %c0_34 = arith.constant 0 : index
    %80 = vector.load %arg8[%c0_33, %c0_34] : memref<1x2xf32, #tpu.memory_space<vmem>>, vector<1x2xf32>
    tpu.vector_store %arg8[%c0_33, %c0_34], %79 {strides = array<i32>} : memref<1x2xf32, #tpu.memory_space<vmem>>, vector<1x2xf32>,
    return
  }
}

</mosaic_0001>

<bundles_post_ra>
// kernel: tpu_custom_call.1
= control target key start
LH: loop header
LB: loop body
LE: loop exit
PB: predicated region body
PF: predicated region fallthrough
CT: control target
= control target key end

     0   :  { %13 = vsyncpa [#allocation3], 0  ;;  %s1503_s0 = inlined_call_operand.hbm [shape: s32[4,16], index: 0, kind: input, shape index: {}]   ;;  %s1504_s1 = inlined_call_operand.hbm [shape: s32[4,16], index: 1, kind: input, shape index: {}]   ;;  %s1505_s2 = inlined_call_operand.hbm [shape: s32[4,16], index: 2, kind: input, shape index: {}]   ;;  %s1506_s3 = inlined_call_operand.vmem [shape: f32[4,16], index: 3, kind: input, shape index: {}]   ;;  %s1507_s4 = inlined_call_operand.hbm [shape: f32[4,16], index: 4, kind: input, shape index: {}]   ;;  %s1508_s5 = inlined_call_operand.vmem [shape: f32[4,16], index: 5, kind: input, shape index: {}]   ;;  %s1509_s6 = inlined_call_operand.hbm [shape: f32[32,128], index: 6, kind: input, shape index: {}]   ;;  %s1510_s7 = inlined_call_operand.hbm [shape: f32[128,128], index: 7, kind: input, shape index: {}]   ;;  %s1511_s8 = inlined_call_operand.hbm [shape: f32[1,2], index: 8, kind: output, shape index: {}]  }
   0x1   :  { %14 = vsyncpa [#allocation6], 0 }
   0x2   :  { %15 = vsyncpa [#allocation9], 0 }
   0x3   :  { %16 = vsyncpa [#allocation12], 0 }
   0x4   :  { %17 = vsyncpa [#allocation4], 0  ;;  %s1189_s27 = smov [#allocation5]   ;;  %s1190_s29 = smov [#allocation8]  }
   0x5   :  { %s34_s28 = sshll.u32 %s1189_s27, 4  ;;  %s56_s30 = sshll.u32 %s1190_s29, 4  ;;  %s35_s28 = int_to_ptr.vmem [resolvable:$true] %s34_s28  ;;  %s57_s30 = int_to_ptr.vmem [resolvable:$true] %s56_s30 }
   0x6   :  { %s1047_s9 = scalar_lea.vmem %s35_s28, 64  ;;  %p1052_p1 = scmp.lt.s32.totalorder %s35_s28, %s35_s28 }
   0x7   :  { %p1048_p0 = scmp.ne.s32.totalorder %s35_s28, %s1047_s9  ;;  %p1053_p2 = scmp.lt.s32.totalorder %s1047_s9, %s1047_s9 }
   0x9   :  { %p1054_p3 = por %p1053_p2, %p1052_p1 }
   0xb   :  { %p1055_p4 = pnand %p1054_p3, %p1048_p0 }
   0xd   :  { %1058 = shalt.err (!%p1055_p4)
}
   0xe   :  { %37 = dma.hbm_to_vmem [thread:$0]  %s1504_s1, 64, %s35_s28, [#allocation6]  }
   0xf   :  { %s1067_s12 = scalar_lea.vmem %s57_s30, 64  ;;  %p1072_p6 = scmp.lt.s32.totalorder %s57_s30, %s57_s30 }
  0x10   :  { %p1068_p5 = scmp.ne.s32.totalorder %s57_s30, %s1067_s12  ;;  %p1073_p7 = scmp.lt.s32.totalorder %s1067_s12, %s1067_s12 }
  0x12   :  { %p1074_p8 = por %p1073_p7, %p1072_p6 }
  0x14   :  { %p1075_p9 = pnand %p1074_p8, %p1068_p5 }
  0x16   :  { %1078 = shalt.err (!%p1075_p9)
}
  0x17   :  { %59 = dma.hbm_to_vmem [thread:$0]  %s1507_s4, 64, %s57_s30, [#allocation9]  }
  0x18   :  { %s1191_s15 = smov [#allocation2]   ;;  %s1192_s17 = smov [#allocation7]  }
  0x19   :  { %s24_s16 = sshll.u32 %s1191_s15, 4  ;;  %s44_s18 = sshll.u32 %s1192_s17, 4  ;;  %s25_s16 = int_to_ptr.vmem [resolvable:$true] %s24_s16  ;;  %s45_s18 = int_to_ptr.vmem [resolvable:$true] %s44_s18 }
  0x1a   :  { %s1087_s19 = scalar_lea.vmem %s25_s16, 64  ;;  %p1092_p11 = scmp.lt.s32.totalorder %s25_s16, %s25_s16 }
  0x1b   :  { %p1088_p10 = scmp.ne.s32.totalorder %s25_s16, %s1087_s19  ;;  %p1093_p12 = scmp.lt.s32.totalorder %s1087_s19, %s1087_s19 }
  0x1d   :  { %p1094_p13 = por %p1093_p12, %p1092_p11 }
  0x1f   :  { %p1095_p0 = pnand %p1094_p13, %p1088_p10 }
  0x21   :  { %1098 = shalt.err (!%p1095_p0)
}
  0x22   :  { %27 = dma.hbm_to_vmem [thread:$0]  %s1503_s0, 64, %s25_s16, [#allocation3]  }
  0x23   :  { %s1107_s21 = scalar_lea.vmem %s45_s18, 64  ;;  %p1112_p2 = scmp.lt.s32.totalorder %s45_s18, %s45_s18 }
  0x24   :  { %p1108_p1 = scmp.ne.s32.totalorder %s45_s18, %s1107_s21  ;;  %p1113_p3 = scmp.lt.s32.totalorder %s1107_s21, %s1107_s21 }
  0x26   :  { %p1114_p4 = por %p1113_p3, %p1112_p2 }
  0x28   :  { %p1115_p5 = pnand %p1114_p4, %p1108_p1 }
  0x2a   :  { %1118 = shalt.err (!%p1115_p5)
}
  0x2b   :  { %47 = dma.hbm_to_vmem [thread:$0]  %s1505_s2, 64, %s45_s18, [#allocation6]  }
  0x2c   :  { %s1193_s23 = smov [#allocation10]  }
  0x2d   :  { %s67_s24 = sshll.u32 %s1193_s23, 4  ;;  %s68_s24 = int_to_ptr.vmem [resolvable:$true] %s67_s24 }
  0x2e   :  { %s1127_s25 = scalar_lea.vmem %s68_s24, 512  ;;  %p1132_p7 = scmp.lt.s32.totalorder %s68_s24, %s68_s24 }
  0x2f   :  { %p1128_p6 = scmp.ne.s32.totalorder %s68_s24, %s1127_s25  ;;  %p1133_p8 = scmp.lt.s32.totalorder %s1127_s25, %s1127_s25 }
  0x31   :  { %p1134_p9 = por %p1133_p8, %p1132_p7 }
  0x33   :  { %p1135_p10 = pnand %p1134_p9, %p1128_p6 }
  0x35   :  { %1138 = shalt.err (!%p1135_p10)
}
  0x36   :  { %s1194_s0 = smov 128   ;;  %s1195_s26 = smov 8  }
  0x37   :  { %73 = dma.hbm_to_vmem [thread:$0]  %s1509_s6, 512, %s68_s24, [#allocation9], %s1194_s0, %s1194_s0, %s1195_s26  }
  0x38   :  { %s1196_s29 = smov [#allocation11]  }
  0x39   :  { %s79_s30 = sshll.u32 %s1196_s29, 4  ;;  %s80_s30 = int_to_ptr.vmem [resolvable:$true] %s79_s30 }
  0x3a   :  { %s1147_s2 = scalar_lea.vmem %s80_s30, 2048  ;;  %p1152_p12 = scmp.lt.s32.totalorder %s80_s30, %s80_s30 }
  0x3b   :  { %p1148_p11 = scmp.ne.s32.totalorder %s80_s30, %s1147_s2  ;;  %p1153_p13 = scmp.lt.s32.totalorder %s1147_s2, %s1147_s2 }
  0x3d   :  { %p1154_p0 = por %p1153_p13, %p1152_p12 }
  0x3f   :  { %p1155_p1 = pnand %p1154_p0, %p1148_p11 }
  0x41   :  { %1158 = shalt.err (!%p1155_p1)
}
  0x42   :  { %85 = dma.hbm_to_vmem [thread:$0]  %s1510_s7, 2048, %s80_s30, [#allocation12], %s1194_s0, %s1194_s0, %s1195_s26  }
  0x43   :  { %1179 = dma.done.wait [#allocation3], 64  }
  0x44   :  { %1180 = vsyncadd [#allocation3], 4294967232 }
  0x45   :  { %1181 = dma.done.wait [#allocation6], 128  }
  0x46   :  { %1182 = vsyncadd [#allocation6], 4294967168 }
  0x47   :  { %1183 = dma.done.wait [#allocation9], 576  }
  0x48   :  { %1184 = vsyncadd [#allocation9], 4294966720 }
  0x49   :  { %1185 = dma.done.wait [#allocation12], 2048  }
  0x4a   :  { %1186 = vsyncadd [#allocation12], 4294965248  ;;  %v230_v0 = vlaneseq  ;;  %vm226_vm0 = vcmask 125952   ;;  %vm213_vm1 = vcmask 1043456   ;;  %vm222_vm2 = vcmask 130048   ;;  %v123_v11 = vld [vmem:[#allocation11 + $0x78] sm:$0xff] }
  0x4b   :  { %v1272_v3 = vld [vmem:[%s1508_s5] sm:$0xf]  ;;  %v216_v5 = vld [vmem:[#allocation8] sm:$0xf]  ;;  %v210_v9 = vld [vmem:[#allocation5] sm:$0xf]  ;;  %962 = vmatprep.subr.mxu0 %v123_v11 }
  0x4c   :  { %v1264_v1 = vshrl.u32 %v230_v0, 7  ;;  %v215_v4 = vld [vmem:[%s1506_s3] sm:$0xf]  ;;  %v227_v6 = vsel %vm226_vm0, %v1272_v3, 0.0  ;;  %v219_v7 = vrot.slane %v216_v5, 4  ;;  %v212_v10 = vrot.slane %v210_v9, 4  ;;  %963 = vmatpush3.msra.mxu0 %v123_v11 }
  0x4d   :  { %v209_v8 = vld [vmem:[#allocation2] sm:$0xf]  ;;  %228 = vadd.xlane.f32.xlu0 %v227_v6  ;;  %v121_v16 = vld [vmem:[#allocation11 + $0x68] sm:$0xff]  ;;  %v120_v18 = vld [vmem:[#allocation11 + $0x60] sm:$0xff]  ;;  %vm557_vm5 = vcmask 261120   ;;  %s1199_s13 = smov [#allocation13]  }
  0x4e   :  { %v1267_v2 = vsub.s32 0, %v1264_v1  ;;  %v122_v12 = vld [vmem:[#allocation11 + $0x70] sm:$0xff]  ;;  %v1279_v13 = vsel %vm213_vm1, %v215_v4, %v219_v7  ;;  %v1283_v15 = vsel %vm213_vm1, %v209_v8, %v212_v10  ;;  %v1288_v19 = vsub.s32 1, %v1264_v1  ;;  %v104_v20 = vld [vmem:[#allocation10] sm:$0xff]  ;;  %v119_v21 = vld [vmem:[#allocation11 + $0x58] sm:$0xff]  ;;  %s919_s14 = sshll.u32 %s1199_s13, 4  ;;  %s920_s14 = int_to_ptr.vmem [resolvable:$true] %s919_s14 }
  0x4f   :  { %v223_v14 = vsel %vm222_vm2, %v1279_v13, 0.0  ;;  %964 = vmatprep.subr.mxu0 %v122_v12  ;;  %994 = vmatprep.mubr.f32.mxu0 %v104_v20  ;;  %v118_v22 = vld [vmem:[#allocation11 + $0x50] sm:$0xff]  ;;  %v1293_v24 = vsub.s32 2, %v1264_v1  ;;  %v117_v25 = vld [vmem:[#allocation11 + $0x48] sm:$0xff]  ;;  %v116_v26 = vld [vmem:[#allocation11 + $0x40] sm:$0xff]  ;;  %v1298_v30 = vsub.s32 3, %v1264_v1  ;;  %p1164_p3 = scmp.lt.s32.totalorder %s920_s14, %s920_s14 }
  0x50   :  { %v248_v17 = vrot.slane %v1283_v15, %v1267_v2  ;;  %965 = vmatpush3.msra.mxu0 %v122_v12  ;;  %v259_v23 = vrot.slane %v1283_v15, %v1288_v19  ;;  %v115_v28 = vld [vmem:[#allocation11 + $0x38] sm:$0xff]  ;;  %v114_v29 = vld [vmem:[#allocation11 + $0x30] sm:$0xff]  ;;  %v113_v31 = vld [vmem:[#allocation11 + $0x28] sm:$0xff]  ;;  %v291_v34 = vsub.s32 4, %v1264_v1  ;;  %v302_v38 = vsub.s32 5, %v1264_v1  ;;  %s1159_s15 = scalar_lea.vmem %s920_s14, 16 }
  0x51   :  { %224 = vadd.xlane.f32.xlu0 %v223_v14  ;;  %966 = vmatprep.subr.mxu0 %v121_v16  ;;  %v270_v27 = vrot.slane %v1283_v15, %v1293_v24  ;;  %v112_v32 = vld [vmem:[#allocation11 + $0x20] sm:$0xff]  ;;  %v281_v33 = vrot.slane %v1283_v15, %v1298_v30  ;;  %v111_v35 = vld [vmem:[#allocation11 + $0x18] sm:$0xff]  ;;  %v110_v36 = vld [vmem:[#allocation11 + $0x10] sm:$0xff]  ;;  %v313_v42 = vsub.s32 6, %v1264_v1  ;;  %v324_v50 = vsub.s32 7, %v1264_v1  ;;  %p1160_p2 = scmp.ne.s32.totalorder %s920_s14, %s1159_s15  ;;  %s1163_s16 = scalar_lea.vmem %s920_s14, 32 }
  0x52   :  { %250 = vbcast.lane.b32.xlu1 %v248_v17, 256  ;;  %967 = vmatpush3.msra.mxu0 %v121_v16  ;;  %v292_v37 = vrot.slane %v1283_v15, %v291_v34  ;;  %v109_v39 = vld [vmem:[#allocation11 + $0x8] sm:$0xff]  ;;  %v108_v40 = vld [vmem:[#allocation11] sm:$0xff]  ;;  %v303_v41 = vrot.slane %v1283_v15, %v302_v38  ;;  %v106_v44 = vld [vmem:[#allocation10 + $0x10] sm:$0xff]  ;;  %p1165_p4 = scmp.lt.s32.totalorder %s1163_s16, %s1159_s15 }
  0x53   :  { %968 = vmatprep.subr.mxu0 %v120_v18  ;;  %v105_v43 = vld [vmem:[#allocation10 + $0x8] sm:$0xff]  ;;  %v314_v45 = vrot.slane %v1283_v15, %v313_v42  ;;  %v107_v46 = vld [vmem:[#allocation10 + $0x18] sm:$0xff]  ;;  %v325_v51 = vrot.slane %v1283_v15, %v324_v50 }
  0x54   :  { %969 = vmatpush3.msra.mxu0 %v120_v18  ;;  %v211_v47 = vld [vmem:[#allocation7] sm:$0xf]  ;;  %p1166_p5 = por %p1165_p4, %p1164_p3 }
  0x55   :  { %970 = vmatprep.subr.mxu0 %v119_v21  ;;  %v336_v48 = vrot.slane %v211_v47, %v1267_v2  ;;  %v347_v49 = vrot.slane %v211_v47, %v1288_v19  ;;  %v358_v52 = vrot.slane %v211_v47, %v1293_v24  ;;  %v369_v53 = vrot.slane %v211_v47, %v1298_v30 }
  0x56   :  { %254 = vbcast.lane.b32.xlu1 %v248_v17, 264  ;;  %971 = vmatpush3.msra.mxu0 %v119_v21  ;;  %p1167_p6 = pnand %p1166_p5, %p1160_p2 }
  0x57   :  { %972 = vmatprep.subr.mxu0 %v118_v22 }
  0x58   :  { %973 = vmatpush3.msra.mxu0 %v118_v22 }
  0x59   :  { %974 = vmatprep.subr.mxu0 %v117_v25 }
  0x5a   :  { %265 = vbcast.lane.b32.xlu1 %v259_v23, 264  ;;  %975 = vmatpush3.msra.mxu0 %v117_v25 }
  0x5b   :  { %976 = vmatprep.subr.mxu0 %v116_v26 }
  0x5c   :  { %977 = vmatpush3.msra.mxu0 %v116_v26 }
  0x5d   :  { %978 = vmatprep.subr.mxu0 %v115_v28 }
  0x5e   :  { %272 = vbcast.lane.b32.xlu1 %v270_v27, 256  ;;  %979 = vmatpush3.msra.mxu0 %v115_v28 }
  0x5f   :  { %980 = vmatprep.subr.mxu0 %v114_v29 }
  0x60   :  { %981 = vmatpush3.msra.mxu0 %v114_v29 }
  0x61   :  { %982 = vmatprep.subr.mxu0 %v113_v31 }
  0x62   :  { %276 = vbcast.lane.b32.xlu1 %v270_v27, 264  ;;  %983 = vmatpush3.msra.mxu0 %v113_v31 }
  0x63   :  { %984 = vmatprep.subr.mxu0 %v112_v32 }
  0x64   :  { %985 = vmatpush3.msra.mxu0 %v112_v32 }
  0x65   :  { %986 = vmatprep.subr.mxu0 %v111_v35 }
  0x66   :  { %283 = vbcast.lane.b32.xlu1 %v281_v33, 256  ;;  %987 = vmatpush3.msra.mxu0 %v111_v35 }
  0x67   :  { %261 = vbcast.lane.b32.xlu0 %v259_v23, 256  ;;  %988 = vmatprep.subr.mxu0 %v110_v36 }
  0x68   :  { %989 = vmatpush3.msra.mxu0 %v110_v36 }
  0x69   :  { %990 = vmatprep.subr.mxu0 %v109_v39 }
  0x6a   :  { %294 = vbcast.lane.b32.xlu1 %v292_v37, 256  ;;  %991 = vmatpush3.msra.mxu0 %v109_v39 }
  0x6b   :  { %287 = vbcast.lane.b32.xlu0 %v281_v33, 264  ;;  %992 = vmatprep.subr.mxu0 %v108_v40 }
  0x6c   :  { %993 = vmatpush3.msra.mxu0 %v108_v40 }
  0x6d   :  { %995 = vmatmul.mubr.f32.vlgmr.msra.gmra.mxu0 %v105_v43 }
  0x6e   :  { %305 = vbcast.lane.b32.xlu1 %v303_v41, 256  ;;  %997 = vmatprep.mubr.f32.mxu0 %v106_v44 }
  0x6f   :  { %298 = vbcast.lane.b32.xlu0 %v292_v37, 264 }
  0x71   :  { %998 = vmatmul.mubr.f32.gmra.mxu0 %v107_v46 }
  0x72   :  { %316 = vbcast.lane.b32.xlu1 %v314_v45, 256 }
  0x73   :  { %309 = vbcast.lane.b32.xlu0 %v303_v41, 264 }
  0x76   :  { %338 = vbcast.lane.b32.xlu1 %v336_v48, 256 }
  0x77   :  { %320 = vbcast.lane.b32.xlu0 %v314_v45, 264  ;;  %v1373_v45 = vand.u32 127, %v230_v0 }
  0x7a   :  { %349 = vbcast.lane.b32.xlu1 %v347_v49, 256 }
  0x7b   :  { %342 = vbcast.lane.b32.xlu0 %v336_v48, 264 }
  0x7e   :  { %327 = vbcast.lane.b32.xlu1 %v325_v51, 256 }
  0x7f   :  { %353 = vbcast.lane.b32.xlu0 %v347_v49, 264 }
  0x82   :  { %360 = vbcast.lane.b32.xlu1 %v358_v52, 256 }
  0x83   :  { %331 = vbcast.lane.b32.xlu0 %v325_v51, 264 }
  0x86   :  { %371 = vbcast.lane.b32.xlu1 %v369_v53, 256 }
  0x87   :  { %364 = vbcast.lane.b32.xlu0 %v358_v52, 264 }
  0x8b   :  { %375 = vbcast.lane.b32.xlu0 %v369_v53, 264 }
  0xc4   :  { %v251_v9 = vpop.permute.xlu1 %250 }
  0xc5   :  { %vm377_vm3 = vcmp.eq.s32.totalorder %v251_v9, %v1373_v45 }
  0xc8   :  { %v255_v11 = vpop.permute.xlu1 %254 }
  0xc9   :  { %vm378_vm4 = vcmp.eq.s32.totalorder %v255_v11, %v1373_v45 }
  0xd6   :  { %v229_v54 = vpop.xlane.xlu0 %228 }
  0xd7   :  { %1031 = vrcp.f32 %v229_v54 }
  0xda   :  { %v225_v55 = vpop.xlane.xlu0 %224 }
  0xdb   :  { %1033 = vrcp.f32 %v225_v55 }
  0xde   :  { %v262_v15 = vpop.permute.xlu0 %261 }
  0xdf   :  { %vm379_vm8 = vcmp.eq.s32.totalorder %v262_v15, %v1373_v45 }
  0xe2   :  { %v1340_v17 = vpop.permute.xlu0 %287 }
  0xe3   :  { %vm384_vm11 = vcmp.eq.s32.totalorder %v1340_v17, %v1373_v45 }
  0xe4   :  { %v1032_v56 = vpop.eup %1031 }
  0xe5   :  { %v240_v57 = vmul.f32 20.0, %v1032_v56 }
  0xe7   :  { %v242_v58 = vmul.f32 %v240_v57, %v1272_v3 }
  0xe8   :  { %v1034_v60 = vpop.eup %1033 }
  0xe9   :  { %v492_v59 = vrot.slane %v242_v58, %v1267_v2  ;;  %v503_v61 = vrot.slane %v242_v58, %v1288_v19  ;;  %v241_v62 = vmul.f32 %v1034_v60, %v1279_v13  ;;  %v514_v63 = vrot.slane %v242_v58, %v1293_v24  ;;  %v266_v13 = vpop.permute.xlu1 %265 }
  0xea   :  { %v525_v12 = vrot.slane %v242_v58, %v1298_v30  ;;  %vm380_vm6 = vcmp.eq.s32.totalorder %v266_v13, %v1373_v45 }
  0xeb   :  { %498 = vbcast.lane.b32.xlu0 %v492_v59, 264  ;;  %494 = vbcast.lane.b32.xlu1 %v492_v59, 256  ;;  %v415_v4 = vrot.slane %v241_v62, %v1288_v19  ;;  %v404_v5 = vrot.slane %v241_v62, %v1267_v2  ;;  %v426_v3 = vrot.slane %v241_v62, %v1293_v24  ;;  %v1344_v19 = vpop.permute.xlu0 %298 }
  0xec   :  { %v437_v6 = vrot.slane %v241_v62, %v1298_v30  ;;  %v448_v7 = vrot.slane %v241_v62, %v291_v34  ;;  %v459_v8 = vrot.slane %v241_v62, %v302_v38  ;;  %v470_v2 = vrot.slane %v241_v62, %v313_v42 }
  0xed   :  { %v481_v10 = vrot.slane %v241_v62, %v324_v50  ;;  %v1336_v14 = vpop.permute.xlu1 %272  ;;  %vm386_vm12 = vcmp.eq.s32.totalorder %v1344_v19, %v1373_v45 }
  0xee   :  { %vm381_vm7 = vcmp.eq.s32.totalorder %v1336_v14, %v1373_v45 }
  0xef   :  { %509 = vbcast.lane.b32.xlu0 %v503_v61, 264  ;;  %505 = vbcast.lane.b32.xlu1 %v503_v61, 256  ;;  %v1348_v24 = vpop.permute.xlu0 %309 }
  0xf0   :  { %vm388_vm2 = vcmp.eq.s32.totalorder %v1348_v24, %v1373_v45 }
  0xf1   :  { %v1338_v16 = vpop.permute.xlu1 %276 }
  0xf2   :  { %vm382_vm9 = vcmp.eq.s32.totalorder %v1338_v16, %v1373_v45 }
  0xf3   :  { %520 = vbcast.lane.b32.xlu0 %v514_v63, 264  ;;  %516 = vbcast.lane.b32.xlu1 %v514_v63, 256  ;;  %v1352_v27 = vpop.permute.xlu0 %320 }
  0xf5   :  { %v1342_v18 = vpop.permute.xlu1 %283 }
  0xf6   :  { %vm383_vm10 = vcmp.eq.s32.totalorder %v1342_v18, %v1373_v45 }
  0xf7   :  { %421 = vbcast.lane.b32.xlu0 %v415_v4, 264  ;;  %406 = vbcast.lane.b32.xlu1 %v404_v5, 256  ;;  %v343_v29 = vpop.permute.xlu0 %342 }
  0xf8   :  { %vm394_vm13 = vcmp.eq.s32.totalorder %v343_v29, %v1373_v45 }
  0xf9   :  { %v1346_v20 = vpop.permute.xlu1 %294 }
  0xfa   :  { %vm385_vm14 = vcmp.eq.s32.totalorder %v1346_v20, %v1373_v45 }
  0xfb   :  { %432 = vbcast.lane.b32.xlu0 %v426_v3, 264  ;;  %410 = vbcast.lane.b32.xlu1 %v404_v5, 264  ;;  %v354_v31 = vpop.permute.xlu0 %353 }
  0xfc   :  { %vm396_vm0 = vcmp.eq.s32.totalorder %v354_v31, %v1373_v45 }
  0xfd   :  { %v1350_v25 = vpop.permute.xlu1 %305 }
  0xff   :  { %443 = vbcast.lane.b32.xlu0 %v437_v6, 264  ;;  %417 = vbcast.lane.b32.xlu1 %v415_v4, 256  ;;  %v1358_v33 = vpop.permute.xlu0 %331 }
 0x101   :  { %v1354_v28 = vpop.permute.xlu1 %316 }
 0x103   :  { %454 = vbcast.lane.b32.xlu0 %v448_v7, 264  ;;  %428 = vbcast.lane.b32.xlu1 %v426_v3, 256  ;;  %v1362_v35 = vpop.permute.xlu0 %364 }
 0x105   :  { %v1356_v30 = vpop.permute.xlu1 %338 }
 0x106   :  { %vm393_vm15 = vcmp.eq.s32.totalorder %v1356_v30, %v1373_v45 }
 0x107   :  { %465 = vbcast.lane.b32.xlu0 %v459_v8, 264  ;;  %439 = vbcast.lane.b32.xlu1 %v437_v6, 256  ;;  %v1366_v37 = vpop.permute.xlu0 %375 }
 0x109   :  { %v350_v32 = vpop.permute.xlu1 %349 }
 0x10a   :  { %vm395_vm1 = vcmp.eq.s32.totalorder %v350_v32, %v1373_v45 }
 0x10b   :  { %476 = vbcast.lane.b32.xlu0 %v470_v2, 264  ;;  %450 = vbcast.lane.b32.xlu1 %v448_v7, 256 }
 0x10d   :  { %v1360_v34 = vpop.permute.xlu1 %327 }
 0x10f   :  { %487 = vbcast.lane.b32.xlu0 %v481_v10, 264  ;;  %461 = vbcast.lane.b32.xlu1 %v459_v8, 256 }
 0x111   :  { %v1364_v36 = vpop.permute.xlu1 %360 }
 0x113   :  { %531 = vbcast.lane.b32.xlu0 %v525_v12, 264  ;;  %472 = vbcast.lane.b32.xlu1 %v470_v2, 256 }
 0x115   :  { %v1368_v38 = vpop.permute.xlu1 %371 }
 0x117   :  { %483 = vbcast.lane.b32.xlu1 %v481_v10, 256 }
 0x11b   :  { %527 = vbcast.lane.b32.xlu1 %v525_v12, 256 }
 0x12d   :  { %v996_v21 = vpop.f32.mrf.mxu0 }
 0x12f   :  { %v190_v22 = vpop.f32.mrf.mxu0 }
 0x131   :  { %v999_v23 = vpop.f32.mrf.mxu0 }
 0x132   :  { %1000 = vmatprep.subr.mxu1 %v999_v23 }
 0x133   :  { %v200_v26 = vpop.f32.mrf.mxu0  ;;  %1001 = vmatpush3.msra.mxu1 %v999_v23 }
 0x134   :  { %1002 = vmatprep.subr.mxu1 %v200_v26 }
 0x135   :  { %1003 = vmatpush3.msra.mxu1 %v200_v26 }
 0x136   :  { %1004 = vmatprep.subr.mxu1 %v996_v21 }
 0x137   :  { %1005 = vmatpush3.msra.mxu1 %v996_v21 }
 0x138   :  { %1006 = vmatprep.subr.mxu1 %v190_v22 }
 0x139   :  { %1007 = vmatpush3.msra.mxu1 %v190_v22 }
 0x15d   :  { %v499_v39 = vpop.permute.xlu0 %498  ;;  %v495_v40 = vpop.permute.xlu1 %494 }
 0x15e   :  { %v550_v4 = vsel %vm394_vm13, %v499_v39, 0.0  ;;  %v549_v21 = vsel %vm393_vm15, %v495_v40, 0.0  ;;  %vm400_vm13 = vcmp.eq.s32.totalorder %v1366_v37, %v1373_v45  ;;  %vm684_vm15 = vcmask 1044484  }
 0x15f   :  { %v631_v14 = vsel %vm557_vm5, %v550_v4, 0.0 }
 0x161   :  { %v510_v41 = vpop.permute.xlu0 %509  ;;  %v506_v42 = vpop.permute.xlu1 %505 }
 0x162   :  { %v552_v6 = vsel %vm396_vm0, %v510_v41, 0.0  ;;  %v551_v9 = vsel %vm395_vm1, %v506_v42, 0.0  ;;  %vm399_vm0 = vcmp.eq.s32.totalorder %v1368_v38, %v1373_v45  ;;  %vm686_vm1 = vcmask 1045509  }
 0x163   :  { %v640_v22 = vsel %vm557_vm5, %v552_v6, 0.0  ;;  %v639_v17 = vsel %vm557_vm5, %v551_v9, 0.0 }
 0x165   :  { %v521_v43 = vpop.permute.xlu0 %520  ;;  %v1370_v44 = vpop.permute.xlu1 %516 }
 0x169   :  { %v422_v46 = vpop.permute.xlu0 %421  ;;  %v407_v47 = vpop.permute.xlu1 %406 }
 0x16a   :  { %v533_v48 = vsel %vm377_vm3, %v407_v47, 0.0  ;;  %v536_v54 = vsel %vm380_vm6, %v422_v46, 0.0  ;;  %vm397_vm3 = vcmp.eq.s32.totalorder %v1364_v36, %v1373_v45  ;;  %vm678_vm6 = vcmask 1041409  }
 0x16b   :  { %v558_v52 = vsel %vm557_vm5, %v533_v48, 0.0  ;;  %v568_v59 = vsel %vm557_vm5, %v536_v54, 0.0  ;;  %v553_v30 = vsel %vm397_vm3, %v1370_v44, 0.0  ;;  %v630_v36 = vsel %vm557_vm5, %v549_v21, 0.0 }
 0x16c   :  { %v641_v44 = vadd.f32 %v640_v22, %v639_v17  ;;  %v648_v18 = vsel %vm557_vm5, %v553_v30, 0.0  ;;  %v632_v20 = vadd.f32 %v631_v14, %v630_v36  ;;  %vm690_vm3 = vcmask 1047559  }
 0x16d   :  { %v433_v49 = vpop.permute.xlu0 %432  ;;  %v411_v50 = vpop.permute.xlu1 %410 }
 0x16e   :  { %v534_v51 = vsel %vm378_vm4, %v411_v50, 0.0  ;;  %v538_v61 = vsel %vm382_vm9, %v433_v49, 0.0  ;;  %vm398_vm4 = vcmp.eq.s32.totalorder %v1362_v35, %v1373_v45  ;;  %vm389_vm9 = vcmp.eq.s32.totalorder %v1354_v28, %v1373_v45 }
 0x16f   :  { %v559_v53 = vsel %vm557_vm5, %v534_v51, 0.0  ;;  %v577_v10 = vsel %vm557_vm5, %v538_v61, 0.0  ;;  %v554_v29 = vsel %vm398_vm4, %v521_v43, 0.0  ;;  %vm1198_vm4 = vmmov 0  }
 0x170   :  { %v560_v0 = vadd.f32 %v559_v53, %v558_v52  ;;  %v649_v47 = vsel %vm557_vm5, %v554_v29, 0.0 }
 0x171   :  { %v444_v55 = vpop.permute.xlu0 %443  ;;  %v418_v56 = vpop.permute.xlu1 %417 }
 0x172   :  { %v561_v57 = vrot.slane %v560_v0, 4  ;;  %v535_v58 = vsel %vm379_vm8, %v418_v56, 0.0  ;;  %v540_v13 = vsel %vm384_vm11, %v444_v55, 0.0  ;;  %vm390_vm8 = vcmp.eq.s32.totalorder %v1352_v27, %v1373_v45 }
 0x173   :  { %v567_v60 = vsel %vm557_vm5, %v535_v58, 0.0  ;;  %v586_v35 = vsel %vm557_vm5, %v540_v13, 0.0  ;;  %vm680_vm11 = vcmask 1042434  }
 0x174   :  { %v562_v62 = vadd.f32 %v561_v57, %v560_v0  ;;  %v569_v63 = vadd.f32 %v568_v59, %v567_v60  ;;  %v650_v60 = vadd.f32 %v649_v47, %v648_v18 }
 0x175   :  { %v455_v5 = vpop.permute.xlu0 %454  ;;  %v429_v3 = vpop.permute.xlu1 %428 }
 0x176   :  { %v563_v7 = vrot.slane %v562_v62, 2  ;;  %v570_v8 = vrot.slane %v569_v63, 4  ;;  %v537_v2 = vsel %vm381_vm7, %v429_v3, 0.0  ;;  %vm387_vm7 = vcmp.eq.s32.totalorder %v1350_v25, %v1373_v45 }
 0x177   :  { %v576_v11 = vsel %vm557_vm5, %v537_v2, 0.0  ;;  %v542_v39 = vsel %vm386_vm12, %v455_v5, 0.0  ;;  %vm391_vm12 = vcmp.eq.s32.totalorder %v1360_v34, %v1373_v45  ;;  %v651_v13 = vrot.slane %v650_v60, 4 }
 0x178   :  { %v564_v12 = vadd.f32 %v563_v7, %v562_v62  ;;  %v571_v15 = vadd.f32 %v570_v8, %v569_v63  ;;  %v578_v16 = vadd.f32 %v577_v10, %v576_v11  ;;  %v595_v53 = vsel %vm557_vm5, %v542_v39, 0.0 }
 0x179   :  { %v466_v23 = vpop.permute.xlu0 %465  ;;  %v440_v26 = vpop.permute.xlu1 %439  ;;  %v642_v63 = vrot.slane %v641_v44, 4  ;;  %v652_v39 = vadd.f32 %v651_v13, %v650_v60 }
 0x17a   :  { %v572_v31 = vrot.slane %v571_v15, 2  ;;  %v579_v32 = vrot.slane %v578_v16, 4  ;;  %v539_v40 = vsel %vm383_vm10, %v440_v26, 0.0  ;;  %v565_v41 = vrot.slane %v564_v12, 1 }
 0x17b   :  { %v585_v46 = vsel %vm557_vm5, %v539_v40, 0.0  ;;  %v544_v54 = vsel %vm388_vm2, %v466_v23, 0.0  ;;  %vm392_vm10 = vcmp.eq.s32.totalorder %v1358_v33, %v1373_v45  ;;  %v643_v21 = vadd.f32 %v642_v63, %v641_v44 }
 0x17c   :  { %v573_v42 = vadd.f32 %v572_v31, %v571_v15  ;;  %v580_v43 = vadd.f32 %v579_v32, %v578_v16  ;;  %v587_v48 = vadd.f32 %v586_v35, %v585_v46  ;;  %v566_v56 = vadd.f32 %v565_v41, %v564_v12 }
 0x17d   :  { %v477_v19 = vpop.permute.xlu0 %476  ;;  %v451_v49 = vpop.permute.xlu1 %450  ;;  %v604_v3 = vsel %vm557_vm5, %v544_v54, 0.0  ;;  %v633_v12 = vrot.slane %v632_v20, 4  ;;  %v653_v34 = vrot.slane %v652_v39, 2  ;;  %vm688_vm2 = vcmask 1046534  }
 0x17e   :  { %v574_v50 = vrot.slane %v573_v42, 1  ;;  %v581_v51 = vrot.slane %v580_v43, 2  ;;  %v541_v52 = vsel %vm385_vm14, %v451_v49, 0.0  ;;  %v588_v0 = vrot.slane %v587_v48, 4 }
 0x17f   :  { %v594_v55 = vsel %vm557_vm5, %v541_v52, 0.0  ;;  %vm682_vm14 = vcmask 1043459   ;;  %v546_v9 = vsel %vm390_vm8, %v477_v19, 0.0  ;;  %v634_v35 = vadd.f32 %v633_v12, %v632_v20 }
 0x180   :  { %v575_v57 = vadd.f32 %v574_v50, %v573_v42  ;;  %v582_v58 = vadd.f32 %v581_v51, %v580_v43  ;;  %v596_v59 = vadd.f32 %v595_v53, %v594_v55  ;;  %v589_v61 = vadd.f32 %v588_v0, %v587_v48 }
 0x181   :  { %v462_v62 = vpop.permute.xlu1 %461  ;;  %v488_v7 = vpop.permute.xlu0 %487  ;;  %v613_v27 = vsel %vm557_vm5, %v546_v9, 0.0  ;;  %v644_v43 = vrot.slane %v643_v21, 2  ;;  %v635_v52 = vrot.slane %v634_v35, 2  ;;  %v654_v38 = vadd.f32 %v653_v34, %v652_v39 }
 0x182   :  { %v679_v24 = vsel %vm678_vm6, %v575_v57, %v566_v56  ;;  %v583_v4 = vrot.slane %v582_v58, 1  ;;  %v597_v5 = vrot.slane %v596_v59, 4  ;;  %v590_v6 = vrot.slane %v589_v61, 2 }
 0x183   :  { %v543_v8 = vsel %vm387_vm7, %v462_v62, 0.0  ;;  %v548_v32 = vsel %vm392_vm10, %v488_v7, 0.0  ;;  %v645_v20 = vadd.f32 %v644_v43, %v643_v21  ;;  %vm844_vm7 = vcmask 60416  }
 0x184   :  { %v584_v2 = vadd.f32 %v583_v4, %v582_v58  ;;  %v598_v10 = vadd.f32 %v597_v5, %v596_v59  ;;  %v603_v11 = vsel %vm557_vm5, %v543_v8, 0.0  ;;  %v591_v15 = vadd.f32 %v590_v6, %v589_v61 }
 0x185   :  { %v605_v16 = vadd.f32 %v604_v3, %v603_v11  ;;  %v473_v14 = vpop.permute.xlu1 %472  ;;  %v532_v41 = vpop.permute.xlu0 %531  ;;  %v622_v47 = vsel %vm557_vm5, %v548_v32, 0.0  ;;  %v646_v7 = vrot.slane %v645_v20, 1  ;;  %v1197_v32 = vmov 0.0  }
 0x186   :  { %v599_v22 = vrot.slane %v598_v10, 2  ;;  %v545_v25 = vsel %vm389_vm9, %v473_v14, 0.0  ;;  %v681_v23 = vsel %vm680_vm11, %v584_v2, %v679_v24  ;;  %v592_v26 = vrot.slane %v591_v15, 1  ;;  %1011 = vmatprep.subr.mxu1 %v1197_v32 }
 0x187   :  { %v606_v17 = vrot.slane %v605_v16, 4  ;;  %v612_v29 = vsel %vm557_vm5, %v545_v25, 0.0  ;;  %v556_v18 = vsel %vm400_vm13, %v532_v41, 0.0  ;;  %v636_v24 = vadd.f32 %v635_v52, %v634_v35 }
 0x188   :  { %v600_v31 = vadd.f32 %v599_v22, %v598_v10  ;;  %v614_v30 = vadd.f32 %v613_v27, %v612_v29  ;;  %v593_v40 = vadd.f32 %v592_v26, %v591_v15  ;;  %v658_v59 = vsel %vm557_vm5, %v556_v18, 0.0 }
 0x189   :  { %v607_v28 = vadd.f32 %v606_v17, %v605_v16  ;;  %v484_v42 = vpop.permute.xlu1 %483  ;;  %v655_v10 = vrot.slane %v654_v38, 1  ;;  %v637_v11 = vrot.slane %v636_v24, 1  ;;  %v647_v16 = vadd.f32 %v646_v7, %v645_v20 }
 0x18a   :  { %v601_v46 = vrot.slane %v600_v31, 1  ;;  %v615_v36 = vrot.slane %v614_v30, 4  ;;  %v547_v44 = vsel %vm391_vm12, %v484_v42, 0.0  ;;  %v683_v19 = vsel %vm682_vm14, %v593_v40, %v681_v23 }
 0x18b   :  { %v608_v48 = vrot.slane %v607_v28, 2  ;;  %v621_v33 = vsel %vm557_vm5, %v547_v44, 0.0  ;;  %v656_v22 = vadd.f32 %v655_v10, %v654_v38  ;;  %v638_v25 = vadd.f32 %v637_v11, %v636_v24 }
 0x18c   :  { %v602_v49 = vadd.f32 %v601_v46, %v600_v31  ;;  %v616_v50 = vadd.f32 %v615_v36, %v614_v30  ;;  %v623_v51 = vadd.f32 %v622_v47, %v621_v33  ;;  %vm857_vm8 = vcmp.eq.s32.totalorder %v1373_v45, %v1264_v1 }
 0x18d   :  { %v609_v53 = vadd.f32 %v608_v48, %v607_v28  ;;  %v528_v54 = vpop.permute.xlu1 %527  ;;  %v692_v17 = vsel %vm678_vm6, %v647_v16, %v638_v25  ;;  %vm862_vm9 = vcmask 3072   ;;  %vm909_vm10 = vcmask 7168  }
 0x18e   :  { %v617_v0 = vrot.slane %v616_v50, 2  ;;  %v624_v55 = vrot.slane %v623_v51, 4  ;;  %v555_v56 = vsel %vm399_vm0, %v528_v54, 0.0  ;;  %v685_v57 = vsel %vm684_vm15, %v602_v49, %v683_v19 }
 0x18f   :  { %v610_v58 = vrot.slane %v609_v53, 1  ;;  %v657_v37 = vsel %vm557_vm5, %v555_v56, 0.0  ;;  %v693_v29 = vsel %vm680_vm11, %v656_v22, %v692_v17  ;;  %vm911_vm12 = vcmask 8192  }
 0x190   :  { %v618_v60 = vadd.f32 %v617_v0, %v616_v50  ;;  %v625_v61 = vadd.f32 %v624_v55, %v623_v51  ;;  %v659_v62 = vadd.f32 %v658_v59, %v657_v37 }
 0x191   :  { %v611_v63 = vadd.f32 %v610_v58, %v609_v53 }
 0x192   :  { %v619_v4 = vrot.slane %v618_v60, 1  ;;  %v626_v5 = vrot.slane %v625_v61, 2  ;;  %v660_v3 = vrot.slane %v659_v62, 4 }
 0x193   :  { %v687_v6 = vsel %vm686_vm1, %v611_v63, %v685_v57 }
 0x194   :  { %v627_v8 = vadd.f32 %v626_v5, %v625_v61  ;;  %v661_v2 = vadd.f32 %v660_v3, %v659_v62  ;;  %v620_v9 = vadd.f32 %v619_v4, %v618_v60 }
 0x196   :  { %v662_v12 = vrot.slane %v661_v2, 2  ;;  %v628_v13 = vrot.slane %v627_v8, 1  ;;  %v689_v15 = vsel %vm688_vm2, %v620_v9, %v687_v6 }
 0x198   :  { %v663_v14 = vadd.f32 %v662_v12, %v661_v2  ;;  %v629_v21 = vadd.f32 %v628_v13, %v627_v8 }
 0x19a   :  { %v664_v23 = vrot.slane %v663_v14, 1  ;;  %v691_v26 = vsel %vm690_vm3, %v629_v21, %v689_v15 }
 0x19b   :  { %1008 = vmatprep.mubr.msk.f32.mxu1 %vm557_vm5, %v691_v26 }
 0x19c   :  { %v665_v27 = vadd.f32 %v664_v23, %v663_v14 }
 0x19e   :  { %v694_v31 = vsel %vm682_vm14, %v665_v27, %v693_v29 }
 0x19f   :  { %1009 = vmatmul.mubr.msk.f32.vlgmr.msra.gmra.mxu1 %vm557_vm5, %v694_v31 }
 0x1a0   :  { %1013 = vmatprep.mubr.msk.f32.mxu1 %vm1198_vm4, %v1197_v32 }
 0x25f   :  { %v1010_v30 = vpop.f32.mrf.mxu1 }
 0x261   :  { %v765_v35 = vpop.f32.mrf.mxu1 }
 0x262   :  { %1012 = vmatpush3.xpose.msra.mxu1 %v765_v35 }
 0x265   :  { %1014 = vmatmul.mubr.f32.vlgmr.msra.gmra.mxu1 %v1010_v30 }
 0x325   :  { %v840_v39 = vpop.f32.mrf.mxu1 }
 0x326   :  { %v845_v40 = vsel %vm844_vm7, %v840_v39, -inf }
 0x327   :  { %846 = vmax.xlane.f32.xlu1 %v845_v40  ;;  %v1015_v28 = vpop.f32.mrf.mxu1 }
 0x3b0   :  { %v847_v41 = vpop.xlane.xlu1 %846 }
 0x3b1   :  { %v848_v42 = vsub.f32 %v840_v39, %v847_v41  ;;  %vm877_vm6 = vcmp.ge.f32.partialorder %v840_v39, %v847_v41 }
 0x3b2   :  { %v878_v46 = vsel %vm877_vm6, %v1373_v45, 8 }
 0x3b3   :  { %v849_v43 = vmul.f32 1.442695, %v848_v42  ;;  %v879_v36 = vsel %vm844_vm7, %v878_v46, 2147483647 }
 0x3b4   :  { %v881_v47 = vshra.s32 %v879_v36, 16  ;;  %v880_v49 = vand.u32 65535, %v879_v36 }
 0x3b5   :  { %1035 = vpow2.f32 %v849_v43 }
 0x3b6   :  { %v883_v33 = vcvt.s32.f32 %v881_v47  ;;  %v882_v50 = vcvt.s32.f32 %v880_v49 }
 0x3c2   :  { %v1036_v44 = vpop.eup %1035 }
 0x3c3   :  { %v851_v48 = vsel %vm844_vm7, %v1036_v44, 0.0 }
 0x3c4   :  { %852 = vadd.xlane.f32.xlu0 %v851_v48 }
 0x3c8   :  { %884 = vmin.xlane.f32.xlu0 %v883_v33 }
 0x44d   :  { %v853_v19 = vpop.xlane.xlu0 %852 }
 0x44e   :  { %1037 = vlog2.f32 %v853_v19 }
 0x451   :  { %v885_v18 = vpop.xlane.xlu0 %884 }
 0x452   :  { %vm886_vm5 = vcmp.eq.f32.partialorder %v883_v33, %v885_v18  ;;  %v891_v55 = vcvt.f32.s32 %v885_v18 }
 0x453   :  { %v887_v51 = vsel %vm886_vm5, %v882_v50, inf }
 0x454   :  { %888 = vmin.xlane.f32.xlu1 %v887_v51  ;;  %v892_v57 = vshll.u32 %v891_v55, 16 }
 0x45b   :  { %v1038_v52 = vpop.eup %1037 }
 0x45c   :  { %v855_v34 = vmul.f32 0.6931472, %v1038_v52 }
 0x45e   :  { %v856_v53 = vsub.f32 %v848_v42, %v855_v34 }
 0x460   :  { %v858_v54 = vsel %vm857_vm8, %v856_v53, 0.0 }
 0x461   :  { %v859_v0 = vsel %vm844_vm7, %v858_v54, 0.0 }
 0x462   :  { %860 = vadd.xlane.f32.xlu0 %v859_v0 }
 0x4dd   :  { %v889_v56 = vpop.xlane.xlu1 %888 }
 0x4de   :  { %v890_v58 = vcvt.f32.s32 %v889_v56 }
 0x4e0   :  { %v893_v59 = vadd.s32 %v892_v57, %v890_v58 }
 0x4e2   :  { %vm894_vm11 = vcmp.eq.s32.totalorder %v893_v59, %v1264_v1 }
 0x4e3   :  { %v933_v37 = vsel %vm894_vm11, 1.0, %v1197_v32 }
 0x4e4   :  { %v897_v20 = vsel %vm862_vm9, %v933_v37, 0.0 }
 0x4e5   :  { %898 = vadd.xlane.f32.xlu0 %v897_v20 }
 0x4eb   :  { %v861_v60 = vpop.xlane.xlu0 %860 }
 0x4ec   :  { %v863_v61 = vsel %vm862_vm9, %v861_v60, 0.0 }
 0x4ed   :  { %864 = vadd.xlane.f32.xlu1 %v863_v61 }
 0x56e   :  { %v899_v45 = vpop.xlane.xlu0 %898 }
 0x56f   :  { %v900_v62 = vrot.slane %v899_v45, 4 }
 0x571   :  { %v901_v38 = vadd.f32 %v900_v62, %v899_v45 }
 0x573   :  { %v902_v63 = vrot.slane %v901_v38, 2 }
 0x575   :  { %v903_v3 = vadd.f32 %v902_v63, %v901_v38 }
 0x576   :  { %v865_v24 = vpop.xlane.xlu1 %864 }
 0x577   :  { %v866_v4 = vrot.slane %v865_v24, 4  ;;  %v904_v8 = vrot.slane %v903_v3, 1 }
 0x579   :  { %v867_v5 = vadd.f32 %v866_v4, %v865_v24  ;;  %v905_v1 = vadd.f32 %v904_v8, %v903_v3 }
 0x57b   :  { %v868_v6 = vrot.slane %v867_v5, 2 }
 0x57d   :  { %v869_v7 = vadd.f32 %v868_v6, %v867_v5 }
 0x57f   :  { %v870_v2 = vrot.slane %v869_v7, 1 }
 0x581   :  { %v871_v9 = vadd.f32 %v870_v2, %v869_v7 }
 0x583   :  { %1016 = vpush %v871_v9 }
 0x584   :  { %1018 = vpush %v905_v1 }
 0x5b4   :  { %s1017_s3 = spop %1016 }
 0x5b5   :  { %v873_v10 = vstv %s1017_s3  ;;  %s1019_s5 = spop %1018 }
 0x5b6   :  { %v875_v11 = vmul.f32 0.25, %v873_v10  ;;  %v907_v12 = vstv %s1019_s5 }
 0x5b7   :  { %v908_v15 = vmul.f32 0.25, %v907_v12 }
 0x5b8   :  { %v876_v13 = vsub.f32 0.0, %v875_v11 }
 0x5ba   :  { %v910_v16 = vsel %vm909_vm10, %v876_v13, %v908_v15 }
 0x5bb   :  { %912 = vst.msk [vmem:[#allocation13] sm:$0x1] %vm911_vm12, %v910_v16 }
 0x5bc   :  { %1170 = shalt.err (!%p1167_p6)
}
 0x5bd   :  { %922 = dma.vmem_to_hbm [thread:$0]  %s920_s14, 16, %s1511_s8, [#allocation4]  }
 0x5be   :  { %1187 = dma.done.wait [#allocation4], 16  }
 0x5bf   :  { %1188 = vsyncadd [#allocation4], 4294967280 }
 0x5c0   :  { %926 = vsyncpa [#allocation3], 1 }
 0x5c1   :  { %927 = vsyncpa [#allocation6], 1 }
 0x5c2   :  { %928 = vsyncpa [#allocation9], 1 }
 0x5c3   :  { %929 = vsyncpa [#allocation12], 1 }
 0x5c4   :  { %930 = vsyncpa [#allocation4], 1 }

</bundles_post_ra>
